<compile_context>
chip_gen: v7x
topology: tpu7x:2x2x1
jax: 0.10.0
libtpu: 0.0.40
codegen_flags: <defaults>
</compile_context>

<pallas_src>
import functools

import jax
import jax.numpy as jnp
from jax.experimental import pallas as pl
from jax.experimental.pallas import tpu as pltpu

HIDDEN1, HIDDEN2, HIDDEN3, HIDDEN4 = 16, 12, 8, 6
OUTPUT_SIZE = 1
BN_EPS = 1e-5
PACK = 8            # batch rows packed into the lane axis
HPAD = 16           # every hidden layer padded to 16 lanes per packed slot
LANES = PACK * HPAD  # 128


def _round_up(n, m):
    return ((n + m - 1) // m) * m


def _mlp_kernel(x_ref, w1_ref, wmid_ref, w5_ref, b14_ref, b5_ref, o_ref):
    """One batch tile, 8 batch rows packed per sublane row.

    x_ref   : (tile_rows, 8*in_size)        caller dtype (f32 or bf16)
    w1_ref  : (8*in_size, 128)  bf16        kron(I8, W1)
    wmid_ref: (384, 128)        bf16        kron(I8, W2'), W3', W4' stacked (BN folded)
    w5_ref  : (128, 8)          bf16        kron(I8, W5' padded to (16,1))
    b14_ref : (8, 128)          f32         rows 0..3 = b1, b2', b3', b4' tiled x8
    b5_ref  : (1, 8)            f32         b5 broadcast over the 8 packed slots
    o_ref   : (tile_rows, 8)    f32         lane j = output of packed batch row j
    """
    x = x_ref[...]
    b14 = b14_ref[...]

    def dense_relu(h, w, brow):
        y = jnp.dot(h.astype(jnp.bfloat16), w, preferred_element_type=jnp.float32)
        return jnp.maximum(y + brow, 0.0)

    h = dense_relu(x, w1_ref[...], b14[0:1, :])            # fc1 + relu1
    h = dense_relu(h, wmid_ref[0:128, :], b14[1:2, :])     # bn1-folded fc2 + relu2 (+ eval dropout = id)
    h = dense_relu(h, wmid_ref[128:256, :], b14[2:3, :])   # bn2-folded fc3 + relu3
    h = dense_relu(h, wmid_ref[256:384, :], b14[3:4, :])   # bn3-folded fc4 + relu4
    y = jnp.dot(h.astype(jnp.bfloat16), w5_ref[...],
                preferred_element_type=jnp.float32)        # bn4-folded fc5
    o_ref[...] = (y + b5_ref[...]).astype(o_ref.dtype)


def prepare_params(params, weight_dtype=jnp.bfloat16):
    """One-time parameter fold + lane-packing glue (hoisted out of the call path).

    Folds eval-mode BatchNorm (affine after ReLU) into the *next* Linear, pads
    every hidden dim to 16, and builds 8x block-diagonal weights so that 8 batch
    rows can live side-by-side on the 128-lane axis.  Weights are stored in bf16
    (MXU input dtype) so no per-grid-step casting is needed; biases stay f32.
    """
    # PyTorch Linear stores (out, in); kernel consumes (in, out).
    w = [jnp.asarray(params[f"w{i}"], jnp.float32).T for i in range(1, 6)]
    b = [jnp.asarray(params[f"b{i}"], jnp.float32) for i in range(1, 6)]

    for i, bn_name in enumerate(["bn1", "bn2", "bn3", "bn4"]):
        gamma, beta, mean, var = (jnp.asarray(a, jnp.float32) for a in params[bn_name])
        s = gamma / jnp.sqrt(var + BN_EPS)
        t = beta - mean * s
        # (h*s + t) @ W + b  ==  h @ (diag(s) @ W) + (t @ W + b)
        b[i + 1] = b[i + 1] + t @ w[i + 1]
        w[i + 1] = s[:, None] * w[i + 1]

    def pad_to(a, rows, cols):
        return jnp.pad(a, ((0, rows - a.shape[0]), (0, cols - a.shape[1])))

    eye8 = jnp.eye(PACK, dtype=jnp.float32)
    in_size = w[0].shape[0]
    # Layer 1: (in_size, 16) -> block-diag (8*in_size, 128).
    w1_big = jnp.kron(eye8, pad_to(w[0], in_size, HPAD))
    # Layers 2-4: pad to (16,16), block-diag to (128,128), stack -> (384,128).
    w_mid = jnp.concatenate(
        [jnp.kron(eye8, pad_to(w[i], HPAD, HPAD)) for i in range(1, 4)], axis=0)
    # Layer 5: (6, 1) -> pad (16,1) -> block-diag (128, 8).
    w5_big = jnp.kron(eye8, pad_to(w[4], HPAD, 1))
    # Biases 1-4: pad to 16 lanes per slot, tile across 8 slots -> (8, 128).
    bias_rows = jnp.stack(
        [jnp.tile(jnp.pad(b[i], (0, HPAD - b[i].shape[0])), PACK) for i in range(4)])
    bias14 = jnp.pad(bias_rows, ((0, 8 - 4), (0, 0)))
    # Bias 5: scalar broadcast over the 8 packed slots.
    bias5 = jnp.broadcast_to(b[4], (1, PACK)).astype(jnp.float32)

    return (w1_big.astype(weight_dtype), w_mid.astype(weight_dtype),
            w5_big.astype(weight_dtype), bias14, bias5)


@functools.partial(jax.jit, static_argnames=("tile_b",))
def improved_neural_net_forward(x, w1_big, w_mid, w5_big, bias14, bias5, *,
                                tile_b=16384):
    """x: (B, input_size) f32 or bf16; remaining args from prepare_params()."""
    B, in_size = x.shape
    B_pad = _round_up(B, PACK)
    if B_pad != B:
        x = jnp.pad(x, ((0, B_pad - B), (0, 0)))   # padded rows are discarded below
    R = B_pad // PACK
    xp = x.reshape(R, PACK * in_size)              # free row-major view: 8 rows / lane row

    # Tile sizing: multiples of 16 rows (bf16 sublane tile); cap so the grid has
    # at least 2 steps whenever possible (v7x megacore split of the batch axis).
    want = max(16, _round_up(tile_b // PACK, 16))
    half = _round_up(pl.cdiv(R, 2), 16)
    tile_rows = min(want, half)
    if tile_rows >= R:
        tile_rows = R                               # full-extent block is always legal
    grid = (pl.cdiv(R, tile_rows),)

    flops = 2 * B_pad * (in_size * HPAD + 3 * HPAD * HPAD + HPAD * OUTPUT_SIZE)
    bytes_accessed = (
        xp.size * xp.dtype.itemsize + R * PACK * 4 +
        w1_big.size * w1_big.dtype.itemsize + w_mid.size * w_mid.dtype.itemsize +
        w5_big.size * w5_big.dtype.itemsize +
        bias14.size * bias14.dtype.itemsize + bias5.size * bias5.dtype.itemsize)
    cost = pl.CostEstimate(flops=flops, transcendentals=0,
                           bytes_accessed=bytes_accessed)

    out = pl.pallas_call(
        _mlp_kernel,
        out_shape=jax.ShapeDtypeStruct((R, PACK), jnp.float32),
        grid_spec=pltpu.PrefetchScalarGridSpec(
            num_scalar_prefetch=0,
            grid=grid,
            in_specs=[
                # streamed, lane-packed batch tiles (double-buffered by Pallas)
                pl.BlockSpec((tile_rows, PACK * in_size), lambda i: (i, 0)),
                # parameters: constant index_map -> DMA'd once, VMEM-resident
                pl.BlockSpec((PACK * in_size, LANES), lambda i: (0, 0)),
                pl.BlockSpec((3 * LANES, LANES), lambda i: (0, 0)),
                pl.BlockSpec((LANES, PACK), lambda i: (0, 0)),
                pl.BlockSpec((8, LANES), lambda i: (0, 0)),
                pl.BlockSpec((1, PACK), lambda i: (0, 0)),
            ],
            out_specs=pl.BlockSpec((tile_rows, PACK), lambda i: (i, 0)),
        ),
        compiler_params=pltpu.CompilerParams(
            dimension_semantics=("parallel",),       # megacore split on v7x
            vmem_limit_bytes=32 * 1024 * 1024,       # fits packed blocks, < v7x 64 MiB/TC
        ),
        cost_estimate=cost,
    )(xp, w1_big, w_mid, w5_big, bias14, bias5)

    # (R, 8) row-major is bit-identical to (B_pad, 1); the reshape is free.
    return out.reshape(B_pad, OUTPUT_SIZE)[:B]


# ----------------------------------------------------------------------------
# Parameter init + reference (for the self-contained correctness check).
# ----------------------------------------------------------------------------
def init_params(key, input_size):
    """Deterministic parameter init mirroring the PyTorch module's shapes."""
    dims = [(input_size, HIDDEN1), (HIDDEN1, HIDDEN2), (HIDDEN2, HIDDEN3),
            (HIDDEN3, HIDDEN4), (HIDDEN4, OUTPUT_SIZE)]
    params = {}
    keys = jax.random.split(key, 32)
    ki = 0
    for i, (fan_in, fan_out) in enumerate(dims, start=1):
        bound = 1.0 / jnp.sqrt(jnp.float32(fan_in))
        params[f"w{i}"] = jax.random.uniform(
            keys[ki], (fan_out, fan_in), jnp.float32, -bound, bound); ki += 1
        params[f"b{i}"] = jax.random.uniform(
            keys[ki], (fan_out,), jnp.float32, -bound, bound); ki += 1
    for i, h in enumerate([HIDDEN1, HIDDEN2, HIDDEN3, HIDDEN4], start=1):
        gamma = jax.random.uniform(keys[ki], (h,), jnp.float32, 0.5, 1.5); ki += 1
        beta = jax.random.uniform(keys[ki], (h,), jnp.float32, -0.5, 0.5); ki += 1
        mean = 0.1 * jax.random.normal(keys[ki], (h,), jnp.float32); ki += 1
        var = jax.random.uniform(keys[ki], (h,), jnp.float32, 0.5, 1.5); ki += 1
        params[f"bn{i}"] = (gamma, beta, mean, var)
    return params


def reference_forward(x, params):
    """Pure-jnp reference faithful to the PyTorch module (eval mode, f32)."""
    h = x
    for i, bn_name in [(1, "bn1"), (2, "bn2"), (3, "bn3"), (4, "bn4")]:
        w, b = params[f"w{i}"], params[f"b{i}"]
        gamma, beta, mean, var = params[bn_name]
        h = h @ w.T + b
        h = jnp.maximum(h, 0.0)
        h = (h - mean) / jnp.sqrt(var + BN_EPS) * gamma + beta
        # dropout(p=0.01) in eval mode is identity
    return h @ params["w5"].T + params["b5"]


if __name__ == "__main__":
    key = jax.random.PRNGKey(0)
    k_x, k_p = jax.random.split(key)

    batch = 200        # not a multiple of 16 -> exercises the partial last block
    input_size = 10    # stand-in for X_input.shape[1] from the csv
    x = jax.random.normal(k_x, (batch, input_size), jnp.float32)
    params = init_params(k_p, input_size)

    # One-time parameter fold / block-diagonal pack (bf16 weights, f32 biases).
    w1_big, w_mid, w5_big, bias14, bias5 = prepare_params(params)

    ref = reference_forward(x, params)

    # f32-input path (x is cast to bf16 only at the MXU; accumulation stays f32).
    out = improved_neural_net_forward(
        x, w1_big, w_mid, w5_big, bias14, bias5, tile_b=256)
    out = jax.block_until_ready(out)
    assert out.shape == (batch, OUTPUT_SIZE)
    assert jnp.allclose(out, ref, atol=5e-2, rtol=5e-2), (
        float(jnp.max(jnp.abs(out - ref))), out[:4], ref[:4])

    # bf16-input path (halves x HBM traffic; same bf16 MXU / f32 accumulate math).
    x_bf16 = x.astype(jnp.bfloat16)
    out_bf16 = improved_neural_net_forward(
        x_bf16, w1_big, w_mid, w5_big, bias14, bias5)
    out_bf16 = jax.block_until_ready(out_bf16)
    assert out_bf16.shape == (batch, OUTPUT_SIZE)
    assert jnp.allclose(out_bf16, ref, atol=6e-2, rtol=6e-2), (
        float(jnp.max(jnp.abs(out_bf16 - ref))), out_bf16[:4], ref[:4])

    print("KERNEL_OK")
</pallas_src>

<mosaic_0001>
module attributes {stable_mosaic.version = 11 : i64} {
  func.func @_mlp_kernel(%arg0: i32, %arg1: memref<16x80xf32, #tpu.memory_space<vmem>>, %arg2: memref<80x128xbf16, #tpu.memory_space<vmem>>, %arg3: memref<384x128xbf16, #tpu.memory_space<vmem>>, %arg4: memref<128x8xbf16, #tpu.memory_space<vmem>>, %arg5: memref<8x128xf32, #tpu.memory_space<vmem>>, %arg6: memref<1x8xf32, #tpu.memory_space<vmem>>, %arg7: memref<16x8xf32, #tpu.memory_space<vmem>>) attributes {dimension_semantics = [#tpu.dimension_semantics<parallel>], iteration_bounds = array<i64: 2>, scalar_prefetch = 0 : i64, scratch_operands = 0 : i64, tpu.core_type = #tpu.core_type<tc>, window_params = [{transform_indices = @transform_0, window_bounds = array<i64: 16, 80>}, {pipeline_mode = #tpu.pipeline_mode<synchronous>, transform_indices = @transform_1, window_bounds = array<i64: 80, 128>}, {pipeline_mode = #tpu.pipeline_mode<synchronous>, transform_indices = @transform_2, window_bounds = array<i64: 384, 128>}, {pipeline_mode = #tpu.pipeline_mode<synchronous>, transform_indices = @transform_3, window_bounds = array<i64: 128, 8>}, {pipeline_mode = #tpu.pipeline_mode<synchronous>, transform_indices = @transform_4, window_bounds = array<i64: 8, 128>}, {pipeline_mode = #tpu.pipeline_mode<synchronous>, transform_indices = @transform_5, window_bounds = array<i64: 1, 8>}, {transform_indices = @transform_6, window_bounds = array<i64: 16, 8>}]} {
    %c0 = arith.constant 0 : index
    %c0_0 = arith.constant 0 : index
    %0 = vector.load %arg1[%c0, %c0_0] : memref<16x80xf32, #tpu.memory_space<vmem>>, vector<16x80xf32>
    %c0_1 = arith.constant 0 : index
    %c0_2 = arith.constant 0 : index
    %1 = vector.load %arg5[%c0_1, %c0_2] : memref<8x128xf32, #tpu.memory_space<vmem>>, vector<8x128xf32>
    %c0_3 = arith.constant 0 : index
    %c0_4 = arith.constant 0 : index
    %2 = vector.load %arg2[%c0_3, %c0_4] : memref<80x128xbf16, #tpu.memory_space<vmem>>, vector<80x128xbf16>
    %3 = vector.extract_strided_slice %1 {offsets = [0, 0], sizes = [1, 128], strides = [1, 1]} : vector<8x128xf32> to vector<1x128xf32>
    %4 = arith.truncf %0 : vector<16x80xf32> to vector<16x80xbf16>
    %cst = arith.constant dense<0.000000e+00> : vector<16x128xf32>
    %5 = tpu.matmul %4, %2, %cst {dimension_numbers = #tpu.dot_dimension_numbers<[1], [0], [0], [1], [0, 0, 1, 1], [], []>} : vector<16x80xbf16>, vector<80x128xbf16>, vector<16x128xf32> -> vector<16x128xf32>
    %6 = vector.broadcast %3 : vector<1x128xf32> to vector<16x128xf32>
    %7 = arith.addf %5, %6 : vector<16x128xf32>
    %cst_5 = arith.constant 0.000000e+00 : f32
    %8 = vector.broadcast %cst_5 : f32 to vector<16x128xf32>
    %9 = arith.maximumf %7, %8 : vector<16x128xf32>
    %c0_6 = arith.constant 0 : index
    %c0_7 = arith.constant 0 : index
    %10 = vector.load %arg3[%c0_6, %c0_7] : memref<384x128xbf16, #tpu.memory_space<vmem>>, vector<128x128xbf16>
    %11 = vector.extract_strided_slice %1 {offsets = [1, 0], sizes = [1, 128], strides = [1, 1]} : vector<8x128xf32> to vector<1x128xf32>
    %12 = arith.truncf %9 : vector<16x128xf32> to vector<16x128xbf16>
    %cst_8 = arith.constant dense<0.000000e+00> : vector<16x128xf32>
    %13 = tpu.matmul %12, %10, %cst_8 {dimension_numbers = #tpu.dot_dimension_numbers<[1], [0], [0], [1], [0, 0, 1, 1], [], []>} : vector<16x128xbf16>, vector<128x128xbf16>, vector<16x128xf32> -> vector<16x128xf32>
    %14 = vector.broadcast %11 : vector<1x128xf32> to vector<16x128xf32>
    %15 = arith.addf %13, %14 : vector<16x128xf32>
    %cst_9 = arith.constant 0.000000e+00 : f32
    %16 = vector.broadcast %cst_9 : f32 to vector<16x128xf32>
    %17 = arith.maximumf %15, %16 : vector<16x128xf32>
    %c128 = arith.constant 128 : index
    %c0_10 = arith.constant 0 : index
    %18 = vector.load %arg3[%c128, %c0_10] : memref<384x128xbf16, #tpu.memory_space<vmem>>, vector<128x128xbf16>
    %19 = vector.extract_strided_slice %1 {offsets = [2, 0], sizes = [1, 128], strides = [1, 1]} : vector<8x128xf32> to vector<1x128xf32>
    %20 = arith.truncf %17 : vector<16x128xf32> to vector<16x128xbf16>
    %cst_11 = arith.constant dense<0.000000e+00> : vector<16x128xf32>
    %21 = tpu.matmul %20, %18, %cst_11 {dimension_numbers = #tpu.dot_dimension_numbers<[1], [0], [0], [1], [0, 0, 1, 1], [], []>} : vector<16x128xbf16>, vector<128x128xbf16>, vector<16x128xf32> -> vector<16x128xf32>
    %22 = vector.broadcast %19 : vector<1x128xf32> to vector<16x128xf32>
    %23 = arith.addf %21, %22 : vector<16x128xf32>
    %cst_12 = arith.constant 0.000000e+00 : f32
    %24 = vector.broadcast %cst_12 : f32 to vector<16x128xf32>
    %25 = arith.maximumf %23, %24 : vector<16x128xf32>
    %c256 = arith.constant 256 : index
    %c0_13 = arith.constant 0 : index
    %26 = vector.load %arg3[%c256, %c0_13] : memref<384x128xbf16, #tpu.memory_space<vmem>>, vector<128x128xbf16>
    %27 = vector.extract_strided_slice %1 {offsets = [3, 0], sizes = [1, 128], strides = [1, 1]} : vector<8x128xf32> to vector<1x128xf32>
    %28 = arith.truncf %25 : vector<16x128xf32> to vector<16x128xbf16>
    %cst_14 = arith.constant dense<0.000000e+00> : vector<16x128xf32>
    %29 = tpu.matmul %28, %26, %cst_14 {dimension_numbers = #tpu.dot_dimension_numbers<[1], [0], [0], [1], [0, 0, 1, 1], [], []>} : vector<16x128xbf16>, vector<128x128xbf16>, vector<16x128xf32> -> vector<16x128xf32>
    %30 = vector.broadcast %27 : vector<1x128xf32> to vector<16x128xf32>
    %31 = arith.addf %29, %30 : vector<16x128xf32>
    %cst_15 = arith.constant 0.000000e+00 : f32
    %32 = vector.broadcast %cst_15 : f32 to vector<16x128xf32>
    %33 = arith.maximumf %31, %32 : vector<16x128xf32>
    %34 = arith.truncf %33 : vector<16x128xf32> to vector<16x128xbf16>
    %c0_16 = arith.constant 0 : index
    %c0_17 = arith.constant 0 : index
    %35 = vector.load %arg4[%c0_16, %c0_17] : memref<128x8xbf16, #tpu.memory_space<vmem>>, vector<128x8xbf16>
    %cst_18 = arith.constant dense<0.000000e+00> : vector<16x8xf32>
    %36 = tpu.matmul %34, %35, %cst_18 {dimension_numbers = #tpu.dot_dimension_numbers<[1], [0], [0], [1], [0, 0, 1, 1], [], []>} : vector<16x128xbf16>, vector<128x8xbf16>, vector<16x8xf32> -> vector<16x8xf32>
    %c0_19 = arith.constant 0 : index
    %c0_20 = arith.constant 0 : index
    %37 = vector.load %arg6[%c0_19, %c0_20] : memref<1x8xf32, #tpu.memory_space<vmem>>, vector<1x8xf32>
    %38 = vector.broadcast %37 : vector<1x8xf32> to vector<16x8xf32>
    %39 = arith.addf %36, %38 : vector<16x8xf32>
    %c0_21 = arith.constant 0 : index
    %c0_22 = arith.constant 0 : index
    %40 = vector.load %arg7[%c0_21, %c0_22] : memref<16x8xf32, #tpu.memory_space<vmem>>, vector<16x8xf32>
    tpu.vector_store %arg7[%c0_21, %c0_22], %39 {strides = array<i32>} : memref<16x8xf32, #tpu.memory_space<vmem>>, vector<16x8xf32>,
    return
  }
  func.func @transform_0(%arg0: i32) -> (i32, i32) {
    %c0_i32 = arith.constant 0 : i32
    %c0_i32_0 = arith.constant 0 : i32
    return %arg0, %c0_i32 : i32, i32
  }
  func.func @transform_1(%arg0: i32) -> (i32, i32) {
    %c0_i32 = arith.constant 0 : i32
    %c0_i32_0 = arith.constant 0 : i32
    %c0_i32_1 = arith.constant 0 : i32
    return %c0_i32, %c0_i32_0 : i32, i32
  }
  func.func @transform_2(%arg0: i32) -> (i32, i32) {
    %c0_i32 = arith.constant 0 : i32
    %c0_i32_0 = arith.constant 0 : i32
    %c0_i32_1 = arith.constant 0 : i32
    return %c0_i32, %c0_i32_0 : i32, i32
  }
  func.func @transform_3(%arg0: i32) -> (i32, i32) {
    %c0_i32 = arith.constant 0 : i32
    %c0_i32_0 = arith.constant 0 : i32
    %c0_i32_1 = arith.constant 0 : i32
    return %c0_i32, %c0_i32_0 : i32, i32
  }
  func.func @transform_4(%arg0: i32) -> (i32, i32) {
    %c0_i32 = arith.constant 0 : i32
    %c0_i32_0 = arith.constant 0 : i32
    %c0_i32_1 = arith.constant 0 : i32
    return %c0_i32, %c0_i32_0 : i32, i32
  }
  func.func @transform_5(%arg0: i32) -> (i32, i32) {
    %c0_i32 = arith.constant 0 : i32
    %c0_i32_0 = arith.constant 0 : i32
    %c0_i32_1 = arith.constant 0 : i32
    return %c0_i32, %c0_i32_0 : i32, i32
  }
  func.func @transform_6(%arg0: i32) -> (i32, i32) {
    %c0_i32 = arith.constant 0 : i32
    %c0_i32_0 = arith.constant 0 : i32
    return %arg0, %c0_i32 : i32, i32
  }
}

</mosaic_0001>

<bundles_post_ra>
// kernel: improved_neural_net_forward.1
= control target key start
LH: loop header
LB: loop body
LE: loop exit
PB: predicated region body
PF: predicated region fallthrough
CT: control target
= control target key end

     0   :  { %s1137_s21 = smov 0   ;;  %s1338_s0 = inlined_call_operand.vmem [shape: f32[25,80], index: 0, kind: input, shape index: {}]   ;;  %s1339_s1 = inlined_call_operand.vmem [shape: bf16[80,128], index: 1, kind: input, shape index: {}]   ;;  %s1340_s2 = inlined_call_operand.vmem [shape: bf16[384,128], index: 2, kind: input, shape index: {}]   ;;  %s1341_s3 = inlined_call_operand.vmem [shape: bf16[128,8], index: 3, kind: input, shape index: {}]   ;;  %s1342_s4 = inlined_call_operand.vmem [shape: f32[8,128], index: 4, kind: input, shape index: {}]   ;;  %s1343_s5 = inlined_call_operand.vmem [shape: f32[1,8], index: 5, kind: input, shape index: {}]   ;;  %s1344_s6 = inlined_call_operand.vmem [shape: f32[25,8], index: 6, kind: output, shape index: {}]  }
   0x1 LB: > { %s859_s22 = sadd.s32 4294967295, %s1098_s21   ;;  %p863_p0 = scmp.ge.s32.totalorder %s1098_s21, 1  ;;  %s1098_s21 = sphi %s1137_s21, %s16_s21  }
   0x2   : > { %p213_p1 = scmp.lt.s32.totalorder %s1098_s21, 3 }
   0x4   : > { %p214_p2 = pnand %p863_p0, %p213_p1 }
   0x5   : > { %v1055_v0 = vld [vmem:[%s1339_s1] sm:$0xff] (!%p214_p2)   ;;  %v1100_v1 = vmov (!%p214_p2), 0.0   ;;  %v1056_v2 = vld [vmem:[%s1339_s1 + $0x8] sm:$0xff] (!%p214_p2)   ;;  %vm1101_vm0 = vmmov (!%p214_p2), 0   ;;  %s864_s27 = sshll.u32 (!%p214_p2), %s859_s22, 1  ;;  %v1057_v4 = vld [vmem:[%s1339_s1 + $0x10] sm:$0xff] (!%p214_p2)   ;;  %v270_v23 = vlaneseq (!%p214_p2) }
   0x6   : > { %217 = sbr.rel (%p214_p2) target bundleno = 1123 (0x463), region = 44  ;;  %951 = vmatprep.subr.bf16.mxu0 (!%p214_p2), %v1100_v1  ;;  %965 = vmatprep.subr.bf16.mxu1 (!%p214_p2), %v1100_v1  ;;  %p244_p3 = scmp.lt.s32.totalorder (!%p214_p2), %s864_s27, 3  ;;  %v1060_v3 = vld [vmem:[%s1340_s2] sm:$0xff] (!%p214_p2)   ;;  %v1061_v5 = vld [vmem:[%s1340_s2 + $0x8] sm:$0xff] (!%p214_p2)   ;;  %v1058_v6 = vld [vmem:[%s1339_s1 + $0x18] sm:$0xff] (!%p214_p2)   ;;  %vm304_vm1 = vcmask (!%p214_p2), 654336  }
   0x7   : > { %952 = vmatpush3.bf16.msra.mxu0 (!%p214_p2), %v1055_v0  ;;  %961 = vmatprep.mubr.msk.bf16.mxu0 (!%p214_p2), %vm1101_vm0, %v1100_v1  ;;  %v1062_v7 = vld [vmem:[%s1340_s2 + $0x10] sm:$0xff] (!%p214_p2)   ;;  %v1059_v8 = vld [vmem:[%s1339_s1 + $0x20] sm:$0xff] (!%p214_p2)   ;;  %v1063_v11 = vld [vmem:[%s1340_s2 + $0x18] sm:$0xff] (!%p214_p2)   ;;  %v1238_v24 = vshrl.u32 (!%p214_p2), %v270_v23, 7  ;;  %vm800_vm2 = vcmask (!%p214_p2), 64512  }
   0x8   : > { %953 = vmatprep.subr.bf16.mxu0 (!%p214_p2), %v1100_v1  ;;  %981 = vmatprep.mubr.msk.bf16.mxu1 (!%p214_p2), %vm1101_vm0, %v1100_v1  ;;  %v1064_v13 = vld [vmem:[%s1340_s2 + $0x20] sm:$0xff] (!%p214_p2)   ;;  %v1065_v14 = vld [vmem:[%s1340_s2 + $0x28] sm:$0xff] (!%p214_p2)   ;;  %v1066_v15 = vld [vmem:[%s1340_s2 + $0x30] sm:$0xff] (!%p214_p2)  }
   0x9   : > { %966 = vmatpush3.bf16.msra.mxu1 (!%p214_p2), %v1060_v3  ;;  %v1067_v16 = vld [vmem:[%s1340_s2 + $0x38] sm:$0xff] (!%p214_p2)   ;;  %v1068_v17 = vld [vmem:[%s1340_s2 + $0x40] sm:$0xff] (!%p214_p2)   ;;  %v1069_v18 = vld [vmem:[%s1340_s2 + $0x48] sm:$0xff] (!%p214_p2)   ;;  %v272_v25 = vsub.s32 (!%p214_p2), 0, %v1238_v24  ;;  %v370_v45 = vsub.s32 (!%p214_p2), 1, %v1238_v24  ;;  %v482_v0 = vsub.s32 (!%p214_p2), 2, %v1238_v24 }
   0xa   : > { %967 = vmatprep.subr.bf16.mxu1 (!%p214_p2), %v1100_v1  ;;  %v1070_v19 = vld [vmem:[%s1340_s2 + $0x50] sm:$0xff] (!%p214_p2)   ;;  %v1071_v20 = vld [vmem:[%s1340_s2 + $0x58] sm:$0xff] (!%p214_p2)   ;;  %v1072_v21 = vld [vmem:[%s1340_s2 + $0x60] sm:$0xff] (!%p214_p2)  }
   0xb   : > { %954 = vmatpush3.bf16.msra.mxu0 (!%p214_p2), %v1056_v2  ;;  %v1073_v22 = vld [vmem:[%s1340_s2 + $0x68] sm:$0xff] (!%p214_p2)   ;;  %v1244_v26 = vld [vmem:[%s1342_s4] sm:$0xff] (!%p214_p2)  ;;  %v1074_v37 = vld [vmem:[%s1340_s2 + $0x70] sm:$0xff] (!%p214_p2)  }
   0xc   : > { %955 = vmatprep.subr.bf16.mxu0 (!%p214_p2), %v1100_v1  ;;  %v273_v27 = vrot.slane (!%p214_p2), %v1244_v26, %v272_v25  ;;  %v1075_v38 = vld [vmem:[%s1340_s2 + $0x78] sm:$0xff] (!%p214_p2)   ;;  %v1076_v39 = vld [vmem:[%s1340_s2 + $0x80] sm:$0xff] (!%p214_p2)   ;;  %v1077_v40 = vld [vmem:[%s1340_s2 + $0x88] sm:$0xff] (!%p214_p2)   ;;  %v371_v46 = vrot.slane (!%p214_p2), %v1244_v26, %v370_v45  ;;  %v483_v2 = vrot.slane (!%p214_p2), %v1244_v26, %v482_v0 }
   0xd   : > { %s1346_s27 = smov (!%p244_p3, %s864_s27), 3  ;;  %968 = vmatpush3.bf16.msra.mxu1 %v1061_v5  ;;  %v1078_v41 = vld [vmem:[%s1340_s2 + $0x90] sm:$0xff]   ;;  %v1079_v42 = vld [vmem:[%s1340_s2 + $0x98] sm:$0xff]   ;;  %v1080_v43 = vld [vmem:[%s1340_s2 + $0xa0] sm:$0xff]  }
   0xe   : > { %s865_s8 = sshll.u32 %s1346_s27, 3  ;;  %969 = vmatprep.subr.bf16.mxu1 %v1100_v1  ;;  %v1081_v44 = vld [vmem:[%s1340_s2 + $0xa8] sm:$0xff]   ;;  %v1082_v56 = vld [vmem:[%s1340_s2 + $0xb0] sm:$0xff]   ;;  %v1083_v57 = vld [vmem:[%s1340_s2 + $0xb8] sm:$0xff]  }
   0xf   : > { %s247_s13 = scalar_lea.vmem %s1338_s0, %s865_s8  ;;  %956 = vmatpush3.bf16.msra.mxu0 %v1057_v4  ;;  %v1084_v58 = vld [vmem:[%s1341_s3] sm:$0xff]   ;;  %v1085_v59 = vld [vmem:[%s1341_s3 + $0x8] sm:$0xff]   ;;  %v1086_v60 = vld [vmem:[%s1341_s3 + $0x10] sm:$0xff]   ;;  %s253_s22 = scalar_lea.vmem %s1344_s6, %s865_s8 }
  0x10   : > { %957 = vmatprep.subr.bf16.mxu0 %v1100_v1  ;;  %v256_v9 = vld [vmem:[%s247_s13] sm:$0xff]  ;;  %v257_v10 = vld [vmem:[%s247_s13 + $0x8] sm:$0xff]  ;;  %v1087_v61 = vld [vmem:[%s1341_s3 + $0x18] sm:$0xff]  }
  0x11   : > { %970 = vmatpush3.bf16.msra.mxu1 %v1062_v7  ;;  %v269_v12 = vpack.c.bf16 %v257_v10, %v256_v9  ;;  %v1088_v62 = vld [vmem:[%s1341_s3 + $0x20] sm:$0xff]   ;;  %v1089_v63 = vld [vmem:[%s1341_s3 + $0x28] sm:$0xff]  }
  0x12   : > { %971 = vmatprep.subr.bf16.mxu1 %v1100_v1 }
  0x13   : > { %958 = vmatpush3.bf16.msra.mxu0 %v1058_v6 }
  0x14   : > { %959 = vmatprep.subr.bf16.mxu0 %v1100_v1 }
  0x15   : > { %972 = vmatpush3.bf16.msra.mxu1 %v1063_v11 }
  0x16   : > { %973 = vmatprep.subr.bf16.mxu1 %v1100_v1 }
  0x17   : > { %960 = vmatpush3.bf16.msra.mxu0 %v1059_v8 }
  0x18   : > { %985 = vmatprep.subr.bf16.mxu0 %v1100_v1 }
  0x19   : > { %974 = vmatpush3.bf16.msra.mxu1 %v1064_v13  ;;  %v1091_v13 = vld [vmem:[%s1341_s3 + $0x38] sm:$0xff]  }
  0x1a   : > { %962 = vmatmul.mubr.msk.bf16.vlgmr.msra.gmra.mrb[0].mxu0 %vm304_vm1, %v269_v12  ;;  %975 = vmatprep.subr.bf16.mxu1 %v1100_v1  ;;  %v1090_v12 = vld [vmem:[%s1341_s3 + $0x30] sm:$0xff]  }
  0x1b   : > { %1001 = vmatprep.mubr.msk.bf16.mxu0 %vm1101_vm0, %v1100_v1  ;;  %986 = vmatpush3.bf16.msra.mxu0 %v1068_v17 }
  0x1c   : > { %987 = vmatprep.subr.bf16.mxu0 %v1100_v1 }
  0x1d   : > { %976 = vmatpush3.bf16.msra.mxu1 %v1065_v14  ;;  %v594_v14 = vsub.s32 3, %v1238_v24 }
  0x1e   : > { %977 = vmatprep.subr.bf16.mxu1 %v1100_v1 }
  0x1f   : > { %988 = vmatpush3.bf16.msra.mxu0 %v1069_v18 }
  0x20   : > { %989 = vmatprep.subr.bf16.mxu0 %v1100_v1 }
  0x21   : > { %978 = vmatpush3.bf16.msra.mxu1 %v1066_v15  ;;  %v595_v15 = vrot.slane %v1244_v26, %v594_v14 }
  0x22   : > { %979 = vmatprep.subr.bf16.mxu1 %v1100_v1 }
  0x23   : > { %990 = vmatpush3.bf16.msra.mxu0 %v1070_v19 }
  0x24   : > { %991 = vmatprep.subr.bf16.mxu0 %v1100_v1 }
  0x25   : > { %980 = vmatpush3.bf16.msra.mxu1 %v1067_v16 }
  0x26   : > { %1005 = vmatprep.subr.bf16.mxu1 %v1100_v1 }
  0x27   : > { %992 = vmatpush3.bf16.msra.mxu0 %v1071_v20 }
  0x28   : > { %993 = vmatprep.subr.bf16.mxu0 %v1100_v1 }
  0x2b   : > { %994 = vmatpush3.bf16.msra.mxu0 %v1072_v21 }
  0x2c   : > { %995 = vmatprep.subr.bf16.mxu0 %v1100_v1 }
  0x2f   : > { %996 = vmatpush3.bf16.msra.mxu0 %v1073_v22 }
  0x30   : > { %997 = vmatprep.subr.bf16.mxu0 %v1100_v1 }
  0x33   : > { %998 = vmatpush3.bf16.msra.mxu0 %v1074_v37 }
  0x34   : > { %999 = vmatprep.subr.bf16.mxu0 %v1100_v1 }
  0x37   : > { %1000 = vmatpush3.bf16.msra.mxu0 %v1075_v38 }
  0x38   : > { %1025 = vmatprep.subr.bf16.mxu0 %v1100_v1 }
  0xed   : > { %v342_v28 = vpop.f32.mrb[0].mxu0 }
  0xee   : > { %v343_v29 = vadd.f32 %v342_v28, %v273_v27  ;;  %v963_v30 = vpop.f32.mrb[1].mxu0 }
  0xef   : > { %v345_v31 = vpop.f32.mrb[2].mxu0 }
  0xf0   : > { %v346_v32 = vadd.f32 %v345_v31, %v273_v27  ;;  %v964_v33 = vpop.f32.mrb[3].mxu0  ;;  %v349_v34 = vmax.f32 %v343_v29, 0.0 }
  0xf2   : > { %v350_v35 = vmax.f32 %v346_v32, 0.0 }
  0xf4   : > { %v367_v36 = vpack.c.bf16 %v350_v35, %v349_v34 }
  0xf6   : > { %982 = vmatmul.mubr.bf16.vlgmr.msra.gmra.mrb[0].mxu1 %v367_v36 }
  0xf7   : > { %1021 = vmatprep.mubr.msk.bf16.mxu1 %vm1101_vm0, %v1100_v1  ;;  %1006 = vmatpush3.bf16.msra.mxu1 %v1076_v39 }
  0xf8   : > { %1007 = vmatprep.subr.bf16.mxu1 %v1100_v1 }
  0xfb   : > { %1008 = vmatpush3.bf16.msra.mxu1 %v1077_v40 }
  0xfc   : > { %1009 = vmatprep.subr.bf16.mxu1 %v1100_v1 }
  0xff   : > { %1010 = vmatpush3.bf16.msra.mxu1 %v1078_v41 }
 0x100   : > { %1011 = vmatprep.subr.bf16.mxu1 %v1100_v1 }
 0x103   : > { %1012 = vmatpush3.bf16.msra.mxu1 %v1079_v42 }
 0x104   : > { %1013 = vmatprep.subr.bf16.mxu1 %v1100_v1 }
 0x107   : > { %1014 = vmatpush3.bf16.msra.mxu1 %v1080_v43 }
 0x108   : > { %1015 = vmatprep.subr.bf16.mxu1 %v1100_v1 }
 0x10b   : > { %1016 = vmatpush3.bf16.msra.mxu1 %v1081_v44 }
 0x10c   : > { %1017 = vmatprep.subr.bf16.mxu1 %v1100_v1 }
 0x10f   : > { %1018 = vmatpush3.bf16.msra.mxu1 %v1082_v56 }
 0x110   : > { %1019 = vmatprep.subr.bf16.mxu1 %v1100_v1 }
 0x113   : > { %1020 = vmatpush3.bf16.msra.mxu1 %v1083_v57 }
 0x1c9   : > { %v454_v47 = vpop.f32.mrb[0].mxu1 }
 0x1ca   : > { %v455_v48 = vadd.f32 %v454_v47, %v371_v46  ;;  %v983_v49 = vpop.f32.mrb[1].mxu1 }
 0x1cb   : > { %v457_v50 = vpop.f32.mrb[2].mxu1 }
 0x1cc   : > { %v458_v51 = vadd.f32 %v457_v50, %v371_v46  ;;  %v984_v52 = vpop.f32.mrb[3].mxu1  ;;  %v461_v53 = vmax.f32 %v455_v48, 0.0 }
 0x1ce   : > { %v462_v54 = vmax.f32 %v458_v51, 0.0 }
 0x1d0   : > { %v479_v55 = vpack.c.bf16 %v462_v54, %v461_v53 }
 0x1d2   : > { %1002 = vmatmul.mubr.bf16.vlgmr.msra.gmra.mrb[4].mxu0 %v479_v55 }
 0x1d3   : > { %1041 = vmatprep.mubr.msk.bf16.mxu0 %vm1101_vm0, %v1100_v1  ;;  %1026 = vmatpush3.bf16.msra.mxu0 %v1084_v58 }
 0x1d4   : > { %1027 = vmatprep.subr.bf16.mxu0 %v1100_v1 }
 0x1d7   : > { %1028 = vmatpush3.bf16.msra.mxu0 %v1085_v59 }
 0x1d8   : > { %1029 = vmatprep.subr.bf16.mxu0 %v1100_v1 }
 0x1db   : > { %1030 = vmatpush3.bf16.msra.mxu0 %v1086_v60 }
 0x1dc   : > { %1031 = vmatprep.subr.bf16.mxu0 %v1100_v1 }
 0x1df   : > { %1032 = vmatpush3.bf16.msra.mxu0 %v1087_v61 }
 0x1e0   : > { %1033 = vmatprep.subr.bf16.mxu0 %v1100_v1 }
 0x1e3   : > { %1034 = vmatpush3.bf16.msra.mxu0 %v1088_v62 }
 0x1e4   : > { %1035 = vmatprep.subr.bf16.mxu0 %v1100_v1 }
 0x1e7   : > { %1036 = vmatpush3.bf16.msra.mxu0 %v1089_v63 }
 0x1e8   : > { %1037 = vmatprep.subr.bf16.mxu0 %v1100_v1 }
 0x1eb   : > { %1038 = vmatpush3.bf16.msra.mxu0 %v1090_v12 }
 0x1ec   : > { %1039 = vmatprep.subr.bf16.mxu0 %v1100_v1  ;;  %v898_v1 = vld [vmem:[%s1343_s5] ss:$0 sm:$0xff] }
 0x1ef   : > { %1040 = vmatpush3.bf16.msra.mxu0 %v1091_v13 }
 0x2a5   : > { %v566_v3 = vpop.f32.mrb[4].mxu0 }
 0x2a6   : > { %v567_v4 = vadd.f32 %v566_v3, %v483_v2  ;;  %v1003_v5 = vpop.f32.mrb[5].mxu0 }
 0x2a7   : > { %v569_v6 = vpop.f32.mrb[6].mxu0 }
 0x2a8   : > { %v570_v7 = vadd.f32 %v569_v6, %v483_v2  ;;  %v1004_v8 = vpop.f32.mrb[7].mxu0  ;;  %v573_v9 = vmax.f32 %v567_v4, 0.0 }
 0x2aa   : > { %v574_v10 = vmax.f32 %v570_v7, 0.0 }
 0x2ac   : > { %v591_v11 = vpack.c.bf16 %v574_v10, %v573_v9 }
 0x2ae   : > { %1022 = vmatmul.mubr.bf16.vlgmr.msra.gmra.mrb[4].mxu1 %v591_v11 }
 0x381   : > { %v678_v16 = vpop.f32.mrb[4].mxu1 }
 0x382   : > { %v679_v17 = vadd.f32 %v678_v16, %v595_v15  ;;  %v1023_v18 = vpop.f32.mrb[5].mxu1 }
 0x383   : > { %v681_v19 = vpop.f32.mrb[6].mxu1 }
 0x384   : > { %v682_v20 = vadd.f32 %v681_v19, %v595_v15  ;;  %v1024_v21 = vpop.f32.mrb[7].mxu1  ;;  %v685_v22 = vmax.f32 %v679_v17, 0.0 }
 0x386   : > { %v686_v23 = vmax.f32 %v682_v20, 0.0 }
 0x388   : > { %v687_v25 = vpack.c.bf16 %v686_v23, %v685_v22 }
 0x38a   : > { %1042 = vmatmul.mubr.bf16.vlgmr.msra.gmra.mrb[8].mxu0 %v687_v25 }
 0x45d   : > { %v793_v24 = vpop.f32.mrb[8].mxu0 }
 0x45e   : > { %v794_v26 = vadd.f32 %v898_v1, %v793_v24  ;;  %v1043_v27 = vpop.f32.mrb[9].mxu0 }
 0x45f   : > { %v796_v28 = vpop.f32.mrb[10].mxu0 }
 0x460   : > { %801 = vst.msk [vmem:[%s253_s22] sm:$0xff] %vm800_vm2, %v794_v26  ;;  %v797_v29 = vadd.f32 %v898_v1, %v796_v28  ;;  %v1044_v30 = vpop.f32.mrb[11].mxu0 }
 0x462   : > { %802 = vst.msk [vmem:[%s253_s22 + $0x8] sm:$0xff] %vm800_vm2, %v797_v29 }
 0x463 PF: > { %s16_s21 = sadd.s32 1, %s1098_s21  }
 0x464   : > { %p13_p4 = scmp.ge.s32.totalorder %s16_s21, 4  }
 0x466   :  { %15 = sbr.rel (!%p13_p4) target bundleno = 1 (0x1), region = 74 }

</bundles_post_ra>
